<compile_context>
chip_gen: v6e
topology: v6e:2x2x1
jax: 0.10.0
libtpu: 0.0.40
codegen_flags: <defaults>
</compile_context>

<pallas_src>
import functools

import jax
import jax.numpy as jnp
import numpy as np
from jax import lax
from jax.experimental import pallas as pl
from jax.experimental.pallas import tpu as pltpu


def _round_up(x, m):
    return (x + m - 1) // m * m


# =============================================================================
# Prologue kernel: batched input projection  gi = x @ [W_ir|W_iz|W_in] + b_i
# (independent across timesteps -> "parallel" grid axis)
# =============================================================================
def _input_proj_kernel(x_ref, wi_ref, bi_ref, gi_ref):
    # bf16 operands, f32 accumulate: single MXU pass on all TPU generations.
    gi_ref[...] = (
        jnp.dot(x_ref[...], wi_ref[...], preferred_element_type=jnp.float32)
        + bi_ref[...]
    )


def _input_projection(x_flat, wi, bi, rows_per_block):
    m, dp = x_flat.shape
    k3 = wi.shape[1]
    n_blocks = m // rows_per_block
    return pl.pallas_call(
        _input_proj_kernel,
        out_shape=jax.ShapeDtypeStruct((m, k3), jnp.float32),
        grid_spec=pltpu.PrefetchScalarGridSpec(
            num_scalar_prefetch=0,
            grid=(n_blocks,),
            in_specs=[
                pl.BlockSpec((rows_per_block, dp), lambda b: (b, 0)),
                pl.BlockSpec(wi.shape, lambda b: (0, 0)),   # resident weights
                pl.BlockSpec(bi.shape, lambda b: (0, 0)),   # resident bias
            ],
            out_specs=pl.BlockSpec((rows_per_block, k3), lambda b: (b, 0)),
        ),
        compiler_params=pltpu.CompilerParams(
            dimension_semantics=("parallel",)),
    )(x_flat, wi, bi)


# =============================================================================
# Fused GRU recurrence kernel: T_CHUNK timesteps per grid iteration
# =============================================================================
def _gru_scan_kernel(gi_ref, h0_ref, wh_ref, bh_ref, hT_ref, *,
                     t_chunk, seq_len):
    """T_CHUNK myGRUCell steps per grid iteration.

    gi_ref: (T_CHUNK, NP, 3*HP) f32   precomputed input projection for chunk
    h0_ref: (NP, HP)            f32   zero-padded initial hidden (resident)
    wh_ref: (HP, 2*HP)          bf16  packed [W_hr | W_hn]       (resident)
    bh_ref: (1, 2*HP)           f32   packed [b_hr | b_hn]       (resident)
    hT_ref: (NP, HP)            f32   resident output block used as the
                                      hidden-state accumulator across chunks
    """
    hp = wh_ref.shape[0]
    c = pl.program_id(0)

    @pl.when(c == 0)
    def _():
        hT_ref[...] = h0_ref[...]          # init accumulator (assumes >=1 chunk)

    wh = wh_ref[...]                        # hoist resident loads out of the loop
    bh = bh_ref[...]

    def step(i, h):
        gi = gi_ref[i]                                        # (NP, 3*HP), f32
        # Tiny per-step hidden projection: bf16 into MXU, f32 accumulate.
        gh = jnp.dot(h.astype(jnp.bfloat16), wh,
                     preferred_element_type=jnp.float32) + bh  # (NP, 2*HP)
        rh = gh[:, :hp]                                       # r_layer_h(h)
        nh = gh[:, hp:]                                       # n_layer_h(h)
        r = jax.nn.sigmoid(gi[:, :hp] + rh)
        z = jax.nn.sigmoid(gi[:, hp:2 * hp] + rh)             # quirk: reuses rh
        n = jnp.tanh(gi[:, 2 * hp:] + r * nh)
        h_new = (1.0 - z) * n + z * h                         # pad lanes stay 0
        # Mask chunk-padding steps beyond the real sequence length.
        return jnp.where(c * t_chunk + i < seq_len, h_new, h)

    hT_ref[...] = lax.fori_loop(0, t_chunk, step, hT_ref[...], unroll=True)


def _run_scan(gi_seq, h0_pad, wh, bh, t_chunk, seq_len):
    l_pad, n_pad, k3 = gi_seq.shape
    hp = wh.shape[0]
    n_chunks = l_pad // t_chunk
    kernel = functools.partial(_gru_scan_kernel,
                               t_chunk=t_chunk, seq_len=seq_len)
    return pl.pallas_call(
        kernel,
        out_shape=jax.ShapeDtypeStruct((n_pad, hp), jnp.float32),
        grid_spec=pltpu.PrefetchScalarGridSpec(
            num_scalar_prefetch=0,
            grid=(n_chunks,),
            in_specs=[
                pl.BlockSpec((t_chunk, n_pad, k3), lambda c: (c, 0, 0)),
                pl.BlockSpec((n_pad, hp), lambda c: (0, 0)),   # h0 resident
                pl.BlockSpec(wh.shape, lambda c: (0, 0)),      # weights resident
                pl.BlockSpec(bh.shape, lambda c: (0, 0)),
            ],
            out_specs=pl.BlockSpec((n_pad, hp), lambda c: (0, 0)),
        ),
        compiler_params=pltpu.CompilerParams(
            dimension_semantics=("arbitrary",)),   # true recurrence over time
    )(gi_seq, h0_pad, wh, bh)


# =============================================================================
# Public wrappers (match the PyTorch module's forward)
# =============================================================================
def _gru_forward(packed, x_seq, h0, t_chunk=8):
    """x_seq: (L, N, D), h0: (N, H) -> final hidden (N, H)."""
    L, N, D = x_seq.shape
    H = h0.shape[-1]
    wi, bi, wh, bh = packed["wi"], packed["bi"], packed["wh"], packed["bh"]
    dp = wi.shape[0]
    hp = wh.shape[0]
    assert L >= 1

    t_chunk = min(t_chunk, L)
    n_chunks = pl.cdiv(L, t_chunk)
    l_pad = n_chunks * t_chunk
    n_pad = _round_up(max(N, 1), 8)

    # Zero-padded, lane/sublane-aligned input slab (bf16 feeds the MXU).
    x_p = jnp.zeros((l_pad, n_pad, dp), jnp.bfloat16)
    x_p = x_p.at[:L, :N, :D].set(x_seq.astype(jnp.bfloat16))
    x_flat = x_p.reshape(l_pad * n_pad, dp)

    # Prologue: all L input projections in one batched, parallel kernel.
    gi_seq = _input_projection(x_flat, wi, bi, t_chunk * n_pad)
    gi_seq = gi_seq.reshape(l_pad, n_pad, wi.shape[1])

    # Padded lanes/rows of h0 must be zero for the padding invariant to hold.
    h0_p = jnp.zeros((n_pad, hp), jnp.float32)
    h0_p = h0_p.at[:N, :H].set(h0.astype(jnp.float32))

    hT = _run_scan(gi_seq, h0_p, wh, bh, t_chunk, L)
    return hT[:N, :H]


def my_gru_cell(packed, x, h):
    """myGRUCell.forward(input, hidden) -> (next_hidden, next_hidden)."""
    h_new = _gru_forward(packed, x[None], h)
    return h_new, h_new


def my_gru_cell_unrolled(packed, x_seq, h0):
    """Apply myGRUCell over a sequence (L, N, D); fused recurrence kernel."""
    return _gru_forward(packed, x_seq, h0)


# =============================================================================
# Parameters: raw (per nn.Linear) and packed (kernel layout)
# =============================================================================
def init_gru_params(key, inputs_size, hidden_size, scale=0.1):
    # zh (z_layer_h) exists in the module but is unused by forward; kept for fidelity.
    names = ("ri", "rh", "zi", "zh", "ni", "nh")
    keys = jax.random.split(key, 2 * len(names))
    p = {}
    for j, name in enumerate(names):
        din = inputs_size if name.endswith("i") else hidden_size
        p[f"w_{name}"] = scale * jax.random.normal(
            keys[2 * j], (din, hidden_size), jnp.float32)
        p[f"b_{name}"] = scale * jax.random.normal(
            keys[2 * j + 1], (hidden_size,), jnp.float32)
    return p


def pack_gru_params(p, inputs_size, hidden_size):
    """Pack + pad gate weights for the kernels (one-time, at build).

    Weights go to bf16 (MXU operands); biases stay f32 (added post-accumulate).
    """
    H = hidden_size
    hp = _round_up(H, 128)
    dp = _round_up(inputs_size, 128)

    wi = jnp.zeros((dp, 3 * hp), jnp.float32)
    wi = (wi.at[:inputs_size, 0:H].set(p["w_ri"])
            .at[:inputs_size, hp:hp + H].set(p["w_zi"])
            .at[:inputs_size, 2 * hp:2 * hp + H].set(p["w_ni"]))
    bi = jnp.zeros((1, 3 * hp), jnp.float32)
    bi = (bi.at[0, 0:H].set(p["b_ri"])
            .at[0, hp:hp + H].set(p["b_zi"])
            .at[0, 2 * hp:2 * hp + H].set(p["b_ni"]))

    wh = jnp.zeros((hp, 2 * hp), jnp.float32)
    wh = (wh.at[:H, 0:H].set(p["w_rh"])
            .at[:H, hp:hp + H].set(p["w_nh"]))
    bh = jnp.zeros((1, 2 * hp), jnp.float32)
    bh = (bh.at[0, 0:H].set(p["b_rh"])
            .at[0, hp:hp + H].set(p["b_nh"]))

    return {"wi": wi.astype(jnp.bfloat16), "bi": bi,
            "wh": wh.astype(jnp.bfloat16), "bh": bh}


# =============================================================================
# Pure-JAX references
# =============================================================================
def ref_gru_cell_f32(p, x, h):
    """Full f32 (HIGHEST) baseline — mirrors the PyTorch module numerics."""
    def mm(a, w):
        return jnp.dot(a, w, precision=jax.lax.Precision.HIGHEST)
    rh = mm(h, p["w_rh"]) + p["b_rh"]
    r = jax.nn.sigmoid(mm(x, p["w_ri"]) + p["b_ri"] + rh)
    z = jax.nn.sigmoid(mm(x, p["w_zi"]) + p["b_zi"] + rh)   # quirk
    n = jnp.tanh(mm(x, p["w_ni"]) + p["b_ni"]
                 + r * (mm(h, p["w_nh"]) + p["b_nh"]))
    return (1.0 - z) * n + z * h


def ref_gru_cell_bf16(p, x, h):
    """Matched-precision reference: bf16 MXU operands, f32 accumulate."""
    bf = jnp.bfloat16
    def mm(a, w):
        return jnp.dot(a.astype(bf), w.astype(bf),
                       preferred_element_type=jnp.float32)
    rh = mm(h, p["w_rh"]) + p["b_rh"]
    r = jax.nn.sigmoid(mm(x, p["w_ri"]) + p["b_ri"] + rh)
    z = jax.nn.sigmoid(mm(x, p["w_zi"]) + p["b_zi"] + rh)   # quirk
    n = jnp.tanh(mm(x, p["w_ni"]) + p["b_ni"]
                 + r * (mm(h, p["w_nh"]) + p["b_nh"]))
    return (1.0 - z) * n + z * h


# =============================================================================
if __name__ == "__main__":
    key = jax.random.PRNGKey(0)
    kp, kx, kh, ks = jax.random.split(key, 4)

    N, D, H, L = 2, 154, 20, 8          # batch, inputs_size, hidden_size, seq
    raw = init_gru_params(kp, D, H)
    packed = pack_gru_params(raw, D, H)

    x = jax.random.normal(kx, (N, D), jnp.float32)
    h = jax.random.normal(kh, (N, H), jnp.float32)
    x_seq = jax.random.normal(ks, (L, N, D), jnp.float32)

    # --- single step: exactly myGRUCell.forward(input, hidden) ---------------
    cell = jax.jit(my_gru_cell)
    h_new, h_new_dup = jax.block_until_ready(cell(packed, x, h))
    assert h_new.shape == (N, H), h_new.shape
    assert bool(jnp.all(jnp.isfinite(h_new)))
    # Structural check against a precision-matched reference (tight):
    ref_m = ref_gru_cell_bf16(raw, x, h)
    np.testing.assert_allclose(np.asarray(h_new), np.asarray(ref_m),
                               rtol=1e-3, atol=1e-3)
    # Numeric-drift sanity check against the full-f32 baseline (loose — bf16 MXU):
    ref_f = ref_gru_cell_f32(raw, x, h)
    np.testing.assert_allclose(np.asarray(h_new), np.asarray(ref_f),
                               rtol=5e-2, atol=5e-2)
    np.testing.assert_allclose(np.asarray(h_new_dup), np.asarray(h_new))

    # --- fused L-step recurrence (prologue + one scan pallas_call) -----------
    scan = jax.jit(my_gru_cell_unrolled)
    hT = jax.block_until_ready(
        scan(packed, x_seq, jnp.zeros((N, H), jnp.float32)))
    assert hT.shape == (N, H), hT.shape
    h_ref_m = jnp.zeros((N, H), jnp.float32)
    h_ref_f = jnp.zeros((N, H), jnp.float32)
    for t in range(L):
        h_ref_m = ref_gru_cell_bf16(raw, x_seq[t], h_ref_m)
        h_ref_f = ref_gru_cell_f32(raw, x_seq[t], h_ref_f)
    np.testing.assert_allclose(np.asarray(hT), np.asarray(h_ref_m),
                               rtol=1e-3, atol=1e-3)
    np.testing.assert_allclose(np.asarray(hT), np.asarray(h_ref_f),
                               rtol=5e-2, atol=5e-2)

    print("KERNEL_OK")
</pallas_src>

<mosaic_0001>
module attributes {stable_mosaic.version = 11 : i64} {
  func.func @_input_proj_kernel(%arg0: i32, %arg1: memref<8x256xbf16, #tpu.memory_space<vmem>>, %arg2: memref<256x384xbf16, #tpu.memory_space<vmem>>, %arg3: memref<1x384xf32, #tpu.memory_space<vmem>>, %arg4: memref<8x384xf32, #tpu.memory_space<vmem>>) attributes {dimension_semantics = [#tpu.dimension_semantics<parallel>], iteration_bounds = array<i64: 1>, scalar_prefetch = 0 : i64, scratch_operands = 0 : i64, tpu.core_type = #tpu.core_type<tc>, window_params = [{transform_indices = @transform_0, window_bounds = array<i64: 8, 256>}, {pipeline_mode = #tpu.pipeline_mode<synchronous>, transform_indices = @transform_1, window_bounds = array<i64: 256, 384>}, {pipeline_mode = #tpu.pipeline_mode<synchronous>, transform_indices = @transform_2, window_bounds = array<i64: 1, 384>}, {transform_indices = @transform_3, window_bounds = array<i64: 8, 384>}]} {
    %c0 = arith.constant 0 : index
    %c0_0 = arith.constant 0 : index
    %0 = vector.load %arg1[%c0, %c0_0] : memref<8x256xbf16, #tpu.memory_space<vmem>>, vector<8x256xbf16>
    %c0_1 = arith.constant 0 : index
    %c0_2 = arith.constant 0 : index
    %1 = vector.load %arg2[%c0_1, %c0_2] : memref<256x384xbf16, #tpu.memory_space<vmem>>, vector<256x384xbf16>
    %cst = arith.constant dense<0.000000e+00> : vector<8x384xf32>
    %2 = tpu.matmul %0, %1, %cst {dimension_numbers = #tpu.dot_dimension_numbers<[1], [0], [0], [1], [0, 0, 1, 1], [], []>} : vector<8x256xbf16>, vector<256x384xbf16>, vector<8x384xf32> -> vector<8x384xf32>
    %c0_3 = arith.constant 0 : index
    %c0_4 = arith.constant 0 : index
    %3 = vector.load %arg3[%c0_3, %c0_4] : memref<1x384xf32, #tpu.memory_space<vmem>>, vector<1x384xf32>
    %4 = vector.broadcast %3 : vector<1x384xf32> to vector<8x384xf32>
    %5 = arith.addf %2, %4 : vector<8x384xf32>
    %c0_5 = arith.constant 0 : index
    %c0_6 = arith.constant 0 : index
    %6 = vector.load %arg4[%c0_5, %c0_6] : memref<8x384xf32, #tpu.memory_space<vmem>>, vector<8x384xf32>
    tpu.vector_store %arg4[%c0_5, %c0_6], %5 {strides = array<i32>} : memref<8x384xf32, #tpu.memory_space<vmem>>, vector<8x384xf32>,
    return
  }
  func.func @transform_0(%arg0: i32) -> (i32, i32) {
    %c0_i32 = arith.constant 0 : i32
    %c0_i32_0 = arith.constant 0 : i32
    return %arg0, %c0_i32 : i32, i32
  }
  func.func @transform_1(%arg0: i32) -> (i32, i32) {
    %c0_i32 = arith.constant 0 : i32
    %c0_i32_0 = arith.constant 0 : i32
    %c0_i32_1 = arith.constant 0 : i32
    return %c0_i32, %c0_i32_0 : i32, i32
  }
  func.func @transform_2(%arg0: i32) -> (i32, i32) {
    %c0_i32 = arith.constant 0 : i32
    %c0_i32_0 = arith.constant 0 : i32
    %c0_i32_1 = arith.constant 0 : i32
    return %c0_i32, %c0_i32_0 : i32, i32
  }
  func.func @transform_3(%arg0: i32) -> (i32, i32) {
    %c0_i32 = arith.constant 0 : i32
    %c0_i32_0 = arith.constant 0 : i32
    return %arg0, %c0_i32 : i32, i32
  }
}

module attributes {stable_mosaic.version = 11 : i64} {
  func.func @_gru_scan_kernel(%arg0: i32, %arg1: memref<1x8x384xf32, #tpu.memory_space<vmem>>, %arg2: memref<8x128xf32, #tpu.memory_space<vmem>>, %arg3: memref<128x256xbf16, #tpu.memory_space<vmem>>, %arg4: memref<1x256xf32, #tpu.memory_space<vmem>>, %arg5: memref<8x128xf32, #tpu.memory_space<vmem>>) attributes {dimension_semantics = [#tpu.dimension_semantics<arbitrary>], iteration_bounds = array<i64: 1>, scalar_prefetch = 0 : i64, scratch_operands = 0 : i64, tpu.core_type = #tpu.core_type<tc>, window_params = [{transform_indices = @transform_0, window_bounds = array<i64: 1, 8, 384>}, {pipeline_mode = #tpu.pipeline_mode<synchronous>, transform_indices = @transform_1, window_bounds = array<i64: 8, 128>}, {pipeline_mode = #tpu.pipeline_mode<synchronous>, transform_indices = @transform_2, window_bounds = array<i64: 128, 256>}, {pipeline_mode = #tpu.pipeline_mode<synchronous>, transform_indices = @transform_3, window_bounds = array<i64: 1, 256>}, {pipeline_mode = #tpu.pipeline_mode<synchronous>, transform_indices = @transform_4, window_bounds = array<i64: 8, 128>}]} {
    %c0_i32 = arith.constant 0 : i32
    %0 = arith.cmpi eq, %arg0, %c0_i32 : i32
    %1 = arith.extui %0 : i1 to i32
    %c0_i32_0 = arith.constant 0 : i32
    %2 = arith.cmpi ne, %1, %c0_i32_0 : i32
    scf.if %2 {
      %c0_16 = arith.constant 0 : index
      %c0_17 = arith.constant 0 : index
      %43 = vector.load %arg2[%c0_16, %c0_17] : memref<8x128xf32, #tpu.memory_space<vmem>>, vector<8x128xf32>
      %c0_18 = arith.constant 0 : index
      %c0_19 = arith.constant 0 : index
      %44 = vector.load %arg5[%c0_18, %c0_19] : memref<8x128xf32, #tpu.memory_space<vmem>>, vector<8x128xf32>
      tpu.vector_store %arg5[%c0_18, %c0_19], %43 {strides = array<i32>} : memref<8x128xf32, #tpu.memory_space<vmem>>, vector<8x128xf32>,
    } else {
    }
    %c0 = arith.constant 0 : index
    %c0_1 = arith.constant 0 : index
    %3 = vector.load %arg3[%c0, %c0_1] : memref<128x256xbf16, #tpu.memory_space<vmem>>, vector<128x256xbf16>
    %c0_2 = arith.constant 0 : index
    %c0_3 = arith.constant 0 : index
    %4 = vector.load %arg4[%c0_2, %c0_3] : memref<1x256xf32, #tpu.memory_space<vmem>>, vector<1x256xf32>
    %c0_4 = arith.constant 0 : index
    %c0_5 = arith.constant 0 : index
    %5 = vector.load %arg5[%c0_4, %c0_5] : memref<8x128xf32, #tpu.memory_space<vmem>>, vector<8x128xf32>
    %c0_i32_6 = arith.constant 0 : i32
    %6 = arith.index_cast %c0_i32_6 : i32 to index
    %c0_7 = arith.constant 0 : index
    %c0_8 = arith.constant 0 : index
    %7 = vector.load %arg1[%6, %c0_7, %c0_8] : memref<1x8x384xf32, #tpu.memory_space<vmem>>, vector<1x8x384xf32>
    %8 = vector.shape_cast %7 : vector<1x8x384xf32> to vector<8x384xf32>
    %9 = arith.truncf %5 : vector<8x128xf32> to vector<8x128xbf16>
    %cst = arith.constant dense<0.000000e+00> : vector<8x256xf32>
    %10 = tpu.matmul %9, %3, %cst {dimension_numbers = #tpu.dot_dimension_numbers<[1], [0], [0], [1], [0, 0, 1, 1], [], []>} : vector<8x128xbf16>, vector<128x256xbf16>, vector<8x256xf32> -> vector<8x256xf32>
    %11 = vector.broadcast %4 : vector<1x256xf32> to vector<8x256xf32>
    %12 = arith.addf %10, %11 : vector<8x256xf32>
    %13 = vector.extract_strided_slice %12 {offsets = [0, 0], sizes = [8, 128], strides = [1, 1]} : vector<8x256xf32> to vector<8x128xf32>
    %14 = vector.extract_strided_slice %12 {offsets = [0, 128], sizes = [8, 128], strides = [1, 1]} : vector<8x256xf32> to vector<8x128xf32>
    %15 = vector.extract_strided_slice %8 {offsets = [0, 0], sizes = [8, 128], strides = [1, 1]} : vector<8x384xf32> to vector<8x128xf32>
    %16 = arith.addf %15, %13 : vector<8x128xf32>
    %17 = arith.negf %16 : vector<8x128xf32>
    %18 = math.exp %17 : vector<8x128xf32>
    %cst_9 = arith.constant 1.000000e+00 : f32
    %19 = vector.broadcast %cst_9 : f32 to vector<8x128xf32>
    %20 = arith.addf %19, %18 : vector<8x128xf32>
    %21 = arith.divf %19, %20 : vector<8x128xf32>
    %22 = vector.extract_strided_slice %8 {offsets = [0, 128], sizes = [8, 128], strides = [1, 1]} : vector<8x384xf32> to vector<8x128xf32>
    %23 = arith.addf %22, %13 : vector<8x128xf32>
    %24 = arith.negf %23 : vector<8x128xf32>
    %25 = math.exp %24 : vector<8x128xf32>
    %cst_10 = arith.constant 1.000000e+00 : f32
    %26 = vector.broadcast %cst_10 : f32 to vector<8x128xf32>
    %27 = arith.addf %26, %25 : vector<8x128xf32>
    %28 = arith.divf %26, %27 : vector<8x128xf32>
    %29 = vector.extract_strided_slice %8 {offsets = [0, 256], sizes = [8, 128], strides = [1, 1]} : vector<8x384xf32> to vector<8x128xf32>
    %30 = arith.mulf %21, %14 : vector<8x128xf32>
    %31 = arith.addf %29, %30 : vector<8x128xf32>
    %32 = math.tanh %31 : vector<8x128xf32>
    %cst_11 = arith.constant 1.000000e+00 : f32
    %33 = vector.broadcast %cst_11 : f32 to vector<8x128xf32>
    %34 = arith.subf %33, %28 : vector<8x128xf32>
    %35 = arith.mulf %34, %32 : vector<8x128xf32>
    %36 = arith.mulf %28, %5 : vector<8x128xf32>
    %37 = arith.addf %35, %36 : vector<8x128xf32>
    %c1_i32 = arith.constant 1 : i32
    %38 = arith.muli %arg0, %c1_i32 : i32
    %39 = arith.addi %38, %c0_i32_6 : i32
    %c1_i32_12 = arith.constant 1 : i32
    %40 = arith.cmpi slt, %39, %c1_i32_12 : i32
    %41 = arith.select %40, %37, %5 : vector<8x128xf32>
    %c1_i32_13 = arith.constant 1 : i32
    %c0_14 = arith.constant 0 : index
    %c0_15 = arith.constant 0 : index
    %42 = vector.load %arg5[%c0_14, %c0_15] : memref<8x128xf32, #tpu.memory_space<vmem>>, vector<8x128xf32>
    tpu.vector_store %arg5[%c0_14, %c0_15], %41 {strides = array<i32>} : memref<8x128xf32, #tpu.memory_space<vmem>>, vector<8x128xf32>,
    return
  }
  func.func @transform_0(%arg0: i32) -> (i32, i32, i32) {
    %c0_i32 = arith.constant 0 : i32
    %c0_i32_0 = arith.constant 0 : i32
    %c0_i32_1 = arith.constant 0 : i32
    return %arg0, %c0_i32, %c0_i32_0 : i32, i32, i32
  }
  func.func @transform_1(%arg0: i32) -> (i32, i32) {
    %c0_i32 = arith.constant 0 : i32
    %c0_i32_0 = arith.constant 0 : i32
    %c0_i32_1 = arith.constant 0 : i32
    return %c0_i32, %c0_i32_0 : i32, i32
  }
  func.func @transform_2(%arg0: i32) -> (i32, i32) {
    %c0_i32 = arith.constant 0 : i32
    %c0_i32_0 = arith.constant 0 : i32
    %c0_i32_1 = arith.constant 0 : i32
    return %c0_i32, %c0_i32_0 : i32, i32
  }
  func.func @transform_3(%arg0: i32) -> (i32, i32) {
    %c0_i32 = arith.constant 0 : i32
    %c0_i32_0 = arith.constant 0 : i32
    %c0_i32_1 = arith.constant 0 : i32
    return %c0_i32, %c0_i32_0 : i32, i32
  }
  func.func @transform_4(%arg0: i32) -> (i32, i32) {
    %c0_i32 = arith.constant 0 : i32
    %c0_i32_0 = arith.constant 0 : i32
    %c0_i32_1 = arith.constant 0 : i32
    return %c0_i32, %c0_i32_0 : i32, i32
  }
}

</mosaic_0001>

<bundles_post_ra>
// kernel: my_gru_cell.3
= control target key start
LH: loop header
LB: loop body
LE: loop exit
PB: predicated region body
PF: predicated region fallthrough
CT: control target
= control target key end

     0   :  { %v262_v1 = vmov 0   ;;  %v47_v19 = vlaneseq  ;;  %s354_s2 = inlined_call_operand.vmem [shape: bf16[128,256], index: 2, kind: input, shape index: {}]   ;;  %s355_s1 = inlined_call_operand.vmem [shape: f32[8,128], index: 1, kind: input, shape index: {}]   ;;  %s356_s3 = inlined_call_operand.vmem [shape: f32[1,256], index: 3, kind: input, shape index: {}]   ;;  %s357_s0 = inlined_call_operand.vmem [shape: f32[1,8,384], index: 0, kind: input, shape index: {}]   ;;  %s358_s4 = inlined_call_operand.vmem [shape: f32[8,128], index: 4, kind: output, shape index: {}]  }
   0x1   :  { %v228_v0 = vld [vmem:[%s354_s2 + $0x74] ss:$8 sps:$4 sm:$0xff]   ;;  %169 = vmatprep.mubr.bf16.mxu0 %v262_v1  ;;  %v230_v2 = vld [vmem:[%s354_s2 + $0x70] ss:$8 sps:$4 sm:$0xff]   ;;  %v231_v3 = vld [vmem:[%s354_s2 + $0x64] ss:$8 sps:$4 sm:$0xff]  }
   0x2   :  { %137 = vmatprep.subr.bf16.mxu0 %v228_v0  ;;  %v233_v4 = vld [vmem:[%s354_s2 + $0x60] ss:$8 sps:$4 sm:$0xff]   ;;  %v234_v5 = vld [vmem:[%s354_s2 + $0x54] ss:$8 sps:$4 sm:$0xff]   ;;  %v236_v6 = vld [vmem:[%s354_s2 + $0x50] ss:$8 sps:$4 sm:$0xff]  }
   0x3   :  { %138 = vmatpush1.bf16.msra.mxu0 %v230_v2  ;;  %v237_v7 = vld [vmem:[%s354_s2 + $0x44] ss:$8 sps:$4 sm:$0xff]   ;;  %v239_v8 = vld [vmem:[%s354_s2 + $0x40] ss:$8 sps:$4 sm:$0xff]   ;;  %v240_v9 = vld [vmem:[%s354_s2 + $0x34] ss:$8 sps:$4 sm:$0xff]  }
   0x4   :  { %139 = vmatprep.subr.bf16.mxu0 %v231_v3  ;;  %v242_v10 = vld [vmem:[%s354_s2 + $0x30] ss:$8 sps:$4 sm:$0xff]   ;;  %v243_v11 = vld [vmem:[%s354_s2 + $0x24] ss:$8 sps:$4 sm:$0xff]   ;;  %v245_v12 = vld [vmem:[%s354_s2 + $0x20] ss:$8 sps:$4 sm:$0xff]  }
   0x5   :  { %v246_v13 = vld [vmem:[%s354_s2 + $0x14] ss:$8 sps:$4 sm:$0xff]   ;;  %v248_v14 = vld [vmem:[%s354_s2 + $0x10] ss:$8 sps:$4 sm:$0xff]   ;;  %v249_v15 = vld [vmem:[%s354_s2 + $0x4] ss:$8 sps:$4 sm:$0xff]  }
   0x6   :  { %v251_v16 = vld [vmem:[%s354_s2] ss:$8 sps:$4 sm:$0xff]   ;;  %v48_v20 = vshrl.u32 %v47_v19, 7  ;;  %v44_v43 = vld [vmem:[%s357_s0 + $0x10] sm:$0xff] }
   0x7   :  { %140 = vmatpush1.bf16.msra.mxu0 %v233_v4  ;;  %v22_v17 = vld [vmem:[%s355_s1] sm:$0xff]  ;;  %v43_v31 = vld [vmem:[%s357_s0 + $0x8] sm:$0xff] }
   0x8   :  { %141 = vmatprep.subr.bf16.mxu0 %v234_v5  ;;  %v45_v18 = vpack.c.bf16 %v22_v17, %v22_v17  ;;  %v49_v21 = vsub.s32 0, %v48_v20  ;;  %v40_v22 = vld [vmem:[%s356_s3] sm:$0x3]  ;;  %v53_v37 = vsub.s32 1, %v48_v20 }
   0x9   :  { %v42_v24 = vld [vmem:[%s357_s0] sm:$0xff] }
   0xa   :  { %v50_v23 = vrot.slane %v40_v22, %v49_v21  ;;  %v54_v39 = vrot.slane %v40_v22, %v53_v37 }
   0xb   :  { %142 = vmatpush1.bf16.msra.mxu0 %v236_v6 }
   0xc   :  { %143 = vmatprep.subr.bf16.mxu0 %v237_v7 }
   0xf   :  { %144 = vmatpush1.bf16.msra.mxu0 %v239_v8 }
  0x10   :  { %145 = vmatprep.subr.bf16.mxu0 %v240_v9 }
  0x13   :  { %146 = vmatpush1.bf16.msra.mxu0 %v242_v10 }
  0x14   :  { %147 = vmatprep.subr.bf16.mxu0 %v243_v11 }
  0x17   :  { %148 = vmatpush1.bf16.msra.mxu0 %v245_v12 }
  0x18   :  { %149 = vmatprep.subr.bf16.mxu0 %v246_v13 }
  0x1b   :  { %150 = vmatpush1.bf16.msra.mxu0 %v248_v14 }
  0x1c   :  { %151 = vmatprep.subr.bf16.mxu0 %v249_v15 }
  0x1f   :  { %152 = vmatpush1.bf16.msra.mxu0 %v251_v16 }
  0x22   :  { %170 = vmatmul.mubr.bf16.vlgmr.msra.gmra.mxu0 %v45_v18 }
  0xe2   :  { %v171_v25 = vpop.f32.mrf.mxu0 }
  0xe3   :  { %v172_v26 = vadd.f32 %v171_v25, %v50_v23 }
  0xe4   :  { %v173_v27 = vpop.f32.mrf.mxu0 }
  0xe5   :  { %v178_v28 = vadd.f32 %v172_v26, %v42_v24  ;;  %v185_v33 = vadd.f32 %v172_v26, %v43_v31  ;;  %v174_v41 = vadd.f32 %v173_v27, %v54_v39 }
  0xe6   :  { %v175_v29 = vpop.f32.mrf.mxu0 }
  0xe7   :  { %v225_v30 = vmul.f32 -1.442695, %v178_v28  ;;  %v226_v34 = vmul.f32 -1.442695, %v185_v33 }
  0xe8   :  { %v176_v32 = vpop.f32.mrf.mxu0 }
  0xe9   :  { %252 = vpow2.f32 %v225_v30 }
  0xea   :  { %254 = vpow2.f32 %v226_v34 }
  0xf6   :  { %v253_v35 = vpop.eup %252 }
  0xf7   :  { %v182_v36 = vadd.f32 1.0, %v253_v35  ;;  %v255_v38 = vpop.eup %254 }
  0xf8   :  { %v189_v40 = vadd.f32 1.0, %v255_v38 }
  0xf9   :  { %256 = vrcp.f32 %v182_v36 }
  0xfa   :  { %258 = vrcp.f32 %v189_v40 }
 0x106   :  { %v257_v42 = vpop.eup %256 }
 0x107   :  { %v192_v44 = vmul.f32 %v257_v42, %v174_v41  ;;  %v259_v46 = vpop.eup %258 }
 0x108   :  { %v195_v47 = vsub.f32 1.0, %v259_v46  ;;  %v197_v49 = vmul.f32 %v259_v46, %v22_v17 }
 0x109   :  { %v193_v45 = vadd.f32 %v192_v44, %v44_v43 }
 0x10b   :  { %260 = vtanh.f32 %v193_v45 }
 0x118   :  { %v261_v48 = vpop.eup %260 }
 0x119   :  { %v196_v50 = vmul.f32 %v261_v48, %v195_v47 }
 0x11b   :  { %v198_v51 = vadd.f32 %v197_v49, %v196_v50 }
 0x11d   :  { %204 = vst [vmem:[%s358_s4] sm:$0xff] %v198_v51 }

// kernel: my_gru_cell.2
= control target key start
LH: loop header
LB: loop body
LE: loop exit
PB: predicated region body
PF: predicated region fallthrough
CT: control target
= control target key end

     0   :  { %8 = vsyncpa [#allocation3], 0  ;;  %s626_s12 = smov [#allocation2]   ;;  %s667_s0 = inlined_call_operand.vmem [shape: bf16[8,256], index: 0, kind: input, shape index: {}]   ;;  %s668_s1 = inlined_call_operand.hbm [shape: bf16[256,384], index: 1, kind: input, shape index: {}]   ;;  %s669_s2 = inlined_call_operand.vmem [shape: f32[1,384], index: 2, kind: input, shape index: {}]   ;;  %s670_s3 = inlined_call_operand.vmem [shape: f32[8,384], index: 3, kind: output, shape index: {}]  }
   0x1   :  { %s16_s13 = sshll.u32 %s626_s12, 4  ;;  %s17_s13 = int_to_ptr.vmem [resolvable:$true] %s16_s13 }
   0x2   :  { %s612_s14 = scalar_lea.vmem %s17_s13, 6144  ;;  %p617_p1 = scmp.lt.s32.totalorder %s17_s13, %s17_s13 }
   0x3   :  { %p613_p0 = scmp.ne.s32.totalorder %s17_s13, %s612_s14  ;;  %p618_p2 = scmp.lt.s32.totalorder %s612_s14, %s612_s14 }
   0x5   :  { %p619_p3 = por %p618_p2, %p617_p1 }
   0x7   :  { %p620_p4 = pnand %p619_p3, %p613_p0 }
   0x9   :  { %623 = shalt.err (!%p620_p4)
}
   0xa   :  { %s627_s15 = smov 192   ;;  %s628_s16 = smov 12  }
   0xb   :  { %22 = dma.hbm_to_vmem [thread:$0]  %s668_s1, 6144, %s17_s13, [#allocation3], %s627_s15, %s627_s15, %s628_s16  }
   0xc   :  { %624 = dma.done.wait [#allocation3], 6144  }
   0xd   :  { %625 = vsyncadd [#allocation3], 4294961152  ;;  %v538_v0 = vld [vmem:[#allocation2 + $0xac] ss:$12 sps:$4 sm:$0xff]   ;;  %v540_v1 = vld [vmem:[#allocation2 + $0xa8] ss:$12 sps:$4 sm:$0xff]   ;;  %v96_v51 = vlaneseq }
   0xe   :  { %374 = vmatprep.subr.bf16.mxu0 %v538_v0  ;;  %v541_v2 = vld [vmem:[#allocation2 + $0x94] ss:$12 sps:$4 sm:$0xff]   ;;  %v543_v3 = vld [vmem:[#allocation2 + $0x90] ss:$12 sps:$4 sm:$0xff]   ;;  %v546_v5 = vld [vmem:[#allocation2 + $0x78] ss:$12 sps:$4 sm:$0xff]  }
   0xf   :  { %375 = vmatpush1.bf16.msra.mxu0 %v540_v1  ;;  %v544_v4 = vld [vmem:[#allocation2 + $0x7c] ss:$12 sps:$4 sm:$0xff]   ;;  %v547_v6 = vld [vmem:[#allocation2 + $0x64] ss:$12 sps:$4 sm:$0xff]   ;;  %v549_v7 = vld [vmem:[#allocation2 + $0x60] ss:$12 sps:$4 sm:$0xff]  }
  0x10   :  { %376 = vmatprep.subr.bf16.mxu0 %v541_v2  ;;  %v559_v8 = vld [vmem:[#allocation2 + $0x170] ss:$12 sps:$4 sm:$0xff]   ;;  %v550_v10 = vld [vmem:[#allocation2 + $0x4c] ss:$12 sps:$4 sm:$0xff]   ;;  %v552_v13 = vld [vmem:[#allocation2 + $0x48] ss:$12 sps:$4 sm:$0xff]  }
  0x11   :  { %v560_v9 = vld [vmem:[#allocation2 + $0xb0] ss:$12 sps:$4 sm:$0xff]   ;;  %513 = vmatprep.subr.bf16.mxu1 %v559_v8  ;;  %v564_v11 = vld [vmem:[#allocation2 + $0x158] ss:$12 sps:$4 sm:$0xff]   ;;  %v553_v14 = vld [vmem:[#allocation2 + $0x34] ss:$12 sps:$4 sm:$0xff]  }
  0x12   :  { %514 = vmatpush3.bf16.msra.mxu1 %v560_v9  ;;  %v565_v12 = vld [vmem:[#allocation2 + $0x98] ss:$12 sps:$4 sm:$0xff]   ;;  %v569_v15 = vld [vmem:[#allocation2 + $0x140] ss:$12 sps:$4 sm:$0xff]   ;;  %v555_v17 = vld [vmem:[#allocation2 + $0x30] ss:$12 sps:$4 sm:$0xff]  }
  0x13   :  { %377 = vmatpush1.bf16.msra.mxu0 %v543_v3  ;;  %515 = vmatprep.subr.bf16.mxu1 %v564_v11  ;;  %v570_v16 = vld [vmem:[#allocation2 + $0x80] ss:$12 sps:$4 sm:$0xff]   ;;  %v556_v18 = vld [vmem:[#allocation2 + $0x1c] ss:$12 sps:$4 sm:$0xff]   ;;  %v558_v21 = vld [vmem:[#allocation2 + $0x18] ss:$12 sps:$4 sm:$0xff]  }
  0x14   :  { %378 = vmatprep.subr.bf16.mxu0 %v544_v4  ;;  %v574_v19 = vld [vmem:[#allocation2 + $0x128] ss:$12 sps:$4 sm:$0xff]   ;;  %v579_v22 = vld [vmem:[#allocation2 + $0x110] ss:$12 sps:$4 sm:$0xff]   ;;  %v584_v25 = vld [vmem:[#allocation2 + $0xf8] ss:$12 sps:$4 sm:$0xff]  }
  0x15   :  { %v575_v20 = vld [vmem:[#allocation2 + $0x68] ss:$12 sps:$4 sm:$0xff]   ;;  %v561_v23 = vld [vmem:[#allocation2 + $0x4] ss:$12 sps:$4 sm:$0xff]   ;;  %v563_v26 = vld [vmem:[#allocation2] ss:$12 sps:$4 sm:$0xff]  }
  0x16   :  { %516 = vmatpush3.bf16.msra.mxu1 %v565_v12  ;;  %v580_v24 = vld [vmem:[#allocation2 + $0x50] ss:$12 sps:$4 sm:$0xff]   ;;  %v566_v27 = vld [vmem:[#allocation2 + $0x16c] ss:$12 sps:$4 sm:$0xff]   ;;  %v568_v30 = vld [vmem:[#allocation2 + $0x168] ss:$12 sps:$4 sm:$0xff]  }
  0x17   :  { %379 = vmatpush1.bf16.msra.mxu0 %v546_v5  ;;  %517 = vmatprep.subr.bf16.mxu1 %v569_v15  ;;  %v585_v28 = vld [vmem:[#allocation2 + $0x38] ss:$12 sps:$4 sm:$0xff]   ;;  %v589_v29 = vld [vmem:[#allocation2 + $0xe0] ss:$12 sps:$4 sm:$0xff]   ;;  %v594_v33 = vld [vmem:[#allocation2 + $0xc8] ss:$12 sps:$4 sm:$0xff]  }
  0x18   :  { %380 = vmatprep.subr.bf16.mxu0 %v547_v6  ;;  %v571_v31 = vld [vmem:[#allocation2 + $0x154] ss:$12 sps:$4 sm:$0xff]   ;;  %v573_v34 = vld [vmem:[#allocation2 + $0x150] ss:$12 sps:$4 sm:$0xff]   ;;  %v578_v39 = vld [vmem:[#allocation2 + $0x138] ss:$12 sps:$4 sm:$0xff]  }
  0x19   :  { %v590_v32 = vld [vmem:[#allocation2 + $0x20] ss:$12 sps:$4 sm:$0xff]   ;;  %v576_v36 = vld [vmem:[#allocation2 + $0x13c] ss:$12 sps:$4 sm:$0xff]   ;;  %v581_v40 = vld [vmem:[#allocation2 + $0x124] ss:$12 sps:$4 sm:$0xff]  }
  0x1a   :  { %518 = vmatpush3.bf16.msra.mxu1 %v570_v16  ;;  %v29_v35 = vld [vmem:[%s667_s0] sm:$0xff]  ;;  %v595_v38 = vld [vmem:[#allocation2 + $0x8] ss:$12 sps:$4 sm:$0xff]   ;;  %v586_v43 = vld [vmem:[#allocation2 + $0x10c] ss:$12 sps:$4 sm:$0xff]   ;;  %v97_v52 = vshrl.u32 %v96_v51, 7 }
  0x1b   :  { %381 = vmatpush1.bf16.msra.mxu0 %v549_v7  ;;  %519 = vmatprep.subr.bf16.mxu1 %v574_v19  ;;  %v464_v37 = vcombine.high %v29_v35, %v29_v35  ;;  %v463_v41 = vcombine.low %v29_v35, %v29_v35  ;;  %v583_v42 = vld [vmem:[#allocation2 + $0x120] ss:$12 sps:$4 sm:$0xff]   ;;  %v588_v44 = vld [vmem:[#allocation2 + $0x108] ss:$12 sps:$4 sm:$0xff]   ;;  %v593_v46 = vld [vmem:[#allocation2 + $0xf0] ss:$12 sps:$4 sm:$0xff]  }
  0x1c   :  { %382 = vmatprep.subr.bf16.mxu0 %v550_v10  ;;  %v591_v45 = vld [vmem:[#allocation2 + $0xf4] ss:$12 sps:$4 sm:$0xff]   ;;  %v596_v47 = vld [vmem:[#allocation2 + $0xdc] ss:$12 sps:$4 sm:$0xff]   ;;  %v600_v48 = vld [vmem:[#allocation2 + $0xd8] ss:$12 sps:$4 sm:$0xff]  }
  0x1d   :  { %447 = vmatprep.mubr.bf16.mxu1 %v464_v37  ;;  %406 = vmatprep.mubr.bf16.mxu0 %v464_v37  ;;  %v601_v49 = vld [vmem:[#allocation2 + $0xc4] ss:$12 sps:$4 sm:$0xff]   ;;  %v603_v50 = vld [vmem:[#allocation2 + $0xc0] ss:$12 sps:$4 sm:$0xff]   ;;  %v106_v53 = vsub.s32 2, %v97_v52  ;;  %v98_v62 = vsub.s32 0, %v97_v52 }
  0x1e   :  { %520 = vmatpush3.bf16.msra.mxu1 %v575_v20  ;;  %v94_v54 = vld [vmem:[%s669_s2] sm:$0x7]  ;;  %v102_v63 = vsub.s32 1, %v97_v52 }
  0x1f   :  { %383 = vmatpush1.bf16.msra.mxu0 %v552_v13  ;;  %521 = vmatprep.subr.bf16.mxu1 %v579_v22  ;;  %v107_v56 = vrot.slane %v94_v54, %v106_v53  ;;  %v99_v0 = vrot.slane %v94_v54, %v98_v62 }
  0x20   :  { %384 = vmatprep.subr.bf16.mxu0 %v553_v14  ;;  %v103_v1 = vrot.slane %v94_v54, %v102_v63 }
  0x22   :  { %522 = vmatpush3.bf16.msra.mxu1 %v580_v24 }
  0x23   :  { %385 = vmatpush1.bf16.msra.mxu0 %v555_v17  ;;  %523 = vmatprep.subr.bf16.mxu1 %v584_v25 }
  0x24   :  { %386 = vmatprep.subr.bf16.mxu0 %v556_v18 }
  0x26   :  { %524 = vmatpush3.bf16.msra.mxu1 %v585_v28 }
  0x27   :  { %387 = vmatpush1.bf16.msra.mxu0 %v558_v21  ;;  %525 = vmatprep.subr.bf16.mxu1 %v589_v29 }
  0x28   :  { %388 = vmatprep.subr.bf16.mxu0 %v561_v23 }
  0x2a   :  { %526 = vmatpush3.bf16.msra.mxu1 %v590_v32 }
  0x2b   :  { %389 = vmatpush1.bf16.msra.mxu0 %v563_v26  ;;  %527 = vmatprep.subr.bf16.mxu1 %v594_v33 }
  0x2c   :  { %390 = vmatprep.subr.bf16.mxu0 %v566_v27 }
  0x2e   :  { %528 = vmatpush3.bf16.msra.mxu1 %v595_v38 }
  0x2f   :  { %391 = vmatpush2.bf16.msra.mxu0 %v568_v30 }
  0x30   :  { %392 = vmatprep.subr.bf16.mxu0 %v571_v31 }
  0x31   :  { %448 = vmatmul.mubr.bf16.vlgmr.msra.gmra.mxu1 %v463_v41 }
  0x33   :  { %393 = vmatpush2.bf16.msra.mxu0 %v573_v34 }
  0x34   :  { %394 = vmatprep.subr.bf16.mxu0 %v576_v36 }
  0x37   :  { %395 = vmatpush2.bf16.msra.mxu0 %v578_v39 }
  0x38   :  { %396 = vmatprep.subr.bf16.mxu0 %v581_v40 }
  0x3b   :  { %397 = vmatpush2.bf16.msra.mxu0 %v583_v42 }
  0x3c   :  { %398 = vmatprep.subr.bf16.mxu0 %v586_v43 }
  0x3f   :  { %399 = vmatpush2.bf16.msra.mxu0 %v588_v44 }
  0x40   :  { %400 = vmatprep.subr.bf16.mxu0 %v591_v45 }
  0x43   :  { %401 = vmatpush2.bf16.msra.mxu0 %v593_v46 }
  0x44   :  { %402 = vmatprep.subr.bf16.mxu0 %v596_v47 }
  0x47   :  { %403 = vmatpush2.bf16.msra.mxu0 %v600_v48 }
  0x48   :  { %404 = vmatprep.subr.bf16.mxu0 %v601_v49 }
  0x4b   :  { %405 = vmatpush2.bf16.msra.mxu0 %v603_v50 }
  0x4e   :  { %407 = vmatmul.mubr.bf16.vlgmr.msra.gmra.mxu0 %v463_v41 }
  0xf1   :  { %v529_v55 = vpop.f32.mrf.mxu1 }
  0xf3   :  { %v530_v57 = vpop.f32.mrf.mxu1 }
  0xf4   :  { %v531_v58 = vadd.f32 %v530_v57, %v529_v55 }
  0xf5   :  { %v532_v59 = vpop.f32.mrf.mxu1 }
  0xf6   :  { %v450_v60 = vadd.f32 %v531_v58, %v107_v56 }
  0xf7   :  { %v533_v61 = vpop.f32.mrf.mxu1 }
  0xf8   :  { %457 = vst [vmem:[%s670_s3 + $0x10] sm:$0xff] %v450_v60 }
 0x10e   :  { %v408_v2 = vpop.f32.mrf.mxu0 }
 0x10f   :  { %v409_v3 = vadd.f32 %v408_v2, %v99_v0 }
 0x110   :  { %v410_v4 = vpop.f32.mrf.mxu0 }
 0x111   :  { %455 = vst [vmem:[%s670_s3] sm:$0xff] %v409_v3  ;;  %v411_v5 = vadd.f32 %v410_v4, %v103_v1 }
 0x112   :  { %v412_v6 = vpop.f32.mrf.mxu0 }
 0x113   :  { %456 = vst [vmem:[%s670_s3 + $0x8] sm:$0xff] %v411_v5 }
 0x114   :  { %v413_v7 = vpop.f32.mrf.mxu0 }
 0x115   :  { %462 = vsyncpa [#allocation3], 1 }

</bundles_post_ra>
